<compile_context>
chip_gen: v7x
topology: tpu7x:2x2x1
jax: 0.10.0
libtpu: 0.0.40
codegen_flags: <defaults>
</compile_context>

<pallas_src>
import jax
import jax.numpy as jnp
from jax.experimental import pallas as pl
from jax.experimental.pallas import tpu as pltpu

IN_CH = 64
OUT_CH = 8


def _conv1x1_relu_kernel(x_ref, wt_ref, b_ref, o_ref):
    """relu(W @ (x + x) + b), emitted as a lane-dense (1, 8) row.

    x_ref : (64, 1)  input channels along sublanes
    wt_ref: (64, 8)  W^T (in-channels along sublanes, out-channels along lanes)
    b_ref : (1, 8)   bias row
    o_ref : (1, 8)   output row (lane-dense)
    """
    x = x_ref[...]                       # (64, 1)
    xx = x + x                           # v1 + v2 (both squeezes of x1)
    # VPU row-scale multiply (broadcast of the size-1 lane dim) + XLU sublane
    # reduction; no MXU for a 512-MAC matvec.
    y = jnp.sum(wt_ref[...] * xx, axis=0, keepdims=True) + b_ref[...]   # (1, 8)
    o_ref[...] = jnp.maximum(y, 0.0).astype(o_ref.dtype)


def prepare_params(weight, bias):
    """One-time parameter prep, hoisted out of the per-call path.

    weight: (8, 64, 1, 1) -> W^T (64, 8) f32;  bias: (8,) -> (1, 8) f32.
    """
    w_t = jnp.asarray(weight, jnp.float32).reshape(OUT_CH, IN_CH).T    # (64, 8)
    b_row = jnp.asarray(bias, jnp.float32).reshape(1, OUT_CH)          # (1, 8)
    return w_t, b_row


@jax.jit
def model_forward(x1, w_t, b_row):
    """x1: (1, 64, 1, 1), w_t: (64, 8), b_row: (1, 8) -> (8, 1, 1)."""
    # Bitcast-level reshape of 64 contiguous f32 values; no packing fusions
    # and no extra HBM round trips in the per-call path.
    x_col = x1.reshape(IN_CH, 1).astype(jnp.float32)                   # (64, 1)

    out_row = pl.pallas_call(
        _conv1x1_relu_kernel,
        out_shape=jax.ShapeDtypeStruct((1, OUT_CH), jnp.float32),
        in_specs=[
            pl.BlockSpec(memory_space=pltpu.MemorySpace.VMEM),
            pl.BlockSpec(memory_space=pltpu.MemorySpace.VMEM),
            pl.BlockSpec(memory_space=pltpu.MemorySpace.VMEM),
        ],
        out_specs=pl.BlockSpec(memory_space=pltpu.MemorySpace.VMEM),
    )(x_col, w_t, b_row)

    # TODO(synk): at batch=1 this op is 100% launch-overhead bound; if called
    # repeatedly, batch x over a lane-dense (N, 64) leading axis with a
    # "parallel" grid dimension (shards across v7x's two TensorCores) and move
    # to the MXU only once N >= ~256 — or fuse into a neighbouring kernel.
    return out_row.reshape(OUT_CH, 1, 1)   # unbatched Conv2d output: (8, 1, 1)


if __name__ == "__main__":
    key = jax.random.PRNGKey(0)
    kx, kw, kb = jax.random.split(key, 3)

    # Deterministic example input matching torch.randn(1, 64, 1, 1)
    x1 = jax.random.normal(kx, (1, IN_CH, 1, 1), dtype=jnp.float32)

    # Deterministic Conv2d(64, 8, 1) parameters (Kaiming-uniform-ish bound)
    bound = 1.0 / (IN_CH ** 0.5)
    weight = jax.random.uniform(
        kw, (OUT_CH, IN_CH, 1, 1), minval=-bound, maxval=bound, dtype=jnp.float32
    )
    bias = jax.random.uniform(
        kb, (OUT_CH,), minval=-bound, maxval=bound, dtype=jnp.float32
    )

    # One-time parameter prep (outside the jitted per-call path).
    w_t, b_row = prepare_params(weight, bias)
    w_t, b_row = jax.block_until_ready((w_t, b_row))

    out = model_forward(x1, w_t, b_row)
    jax.block_until_ready(out)

    # Reference check in plain JAX
    ref = jnp.maximum(
        weight.reshape(OUT_CH, IN_CH) @ (2.0 * x1.reshape(IN_CH, 1))
        + bias.reshape(OUT_CH, 1),
        0.0,
    ).reshape(OUT_CH, 1, 1)
    assert out.shape == (OUT_CH, 1, 1)
    assert jnp.allclose(out, ref, atol=1e-5, rtol=1e-5)

    print("KERNEL_OK")
</pallas_src>

<mosaic_0001>
module attributes {stable_mosaic.version = 11 : i64} {
  func.func @_conv1x1_relu_kernel(%arg0: memref<64x1xf32, #tpu.memory_space<vmem>>, %arg1: memref<64x8xf32, #tpu.memory_space<vmem>>, %arg2: memref<1x8xf32, #tpu.memory_space<vmem>>, %arg3: memref<1x8xf32, #tpu.memory_space<vmem>>) attributes {dimension_semantics = [], scalar_prefetch = 0 : i64, scratch_operands = 0 : i64, tpu.core_type = #tpu.core_type<tc>} {
    %c0 = arith.constant 0 : index
    %c0_0 = arith.constant 0 : index
    %0 = vector.load %arg0[%c0, %c0_0] : memref<64x1xf32, #tpu.memory_space<vmem>>, vector<64x1xf32>
    %1 = arith.addf %0, %0 : vector<64x1xf32>
    %c0_1 = arith.constant 0 : index
    %c0_2 = arith.constant 0 : index
    %2 = vector.load %arg1[%c0_1, %c0_2] : memref<64x8xf32, #tpu.memory_space<vmem>>, vector<64x8xf32>
    %3 = vector.broadcast %1 : vector<64x1xf32> to vector<64x8xf32>
    %4 = arith.mulf %2, %3 : vector<64x8xf32>
    %cst = arith.constant dense<0.000000e+00> : vector<8xf32>
    %5 = vector.multi_reduction <add>, %4, %cst [0] : vector<64x8xf32> to vector<8xf32>
    %6 = vector.shape_cast %5 : vector<8xf32> to vector<1x8xf32>
    %c0_3 = arith.constant 0 : index
    %c0_4 = arith.constant 0 : index
    %7 = vector.load %arg2[%c0_3, %c0_4] : memref<1x8xf32, #tpu.memory_space<vmem>>, vector<1x8xf32>
    %8 = arith.addf %6, %7 : vector<1x8xf32>
    %cst_5 = arith.constant 0.000000e+00 : f32
    %9 = vector.broadcast %cst_5 : f32 to vector<1x8xf32>
    %10 = arith.maximumf %8, %9 : vector<1x8xf32>
    %c0_6 = arith.constant 0 : index
    %c0_7 = arith.constant 0 : index
    %11 = vector.load %arg3[%c0_6, %c0_7] : memref<1x8xf32, #tpu.memory_space<vmem>>, vector<1x8xf32>
    tpu.vector_store %arg3[%c0_6, %c0_7], %10 {strides = array<i32>} : memref<1x8xf32, #tpu.memory_space<vmem>>, vector<1x8xf32>,
    return
  }
}

</mosaic_0001>

<bundles_post_ra>
// kernel: model_forward.1
= control target key start
LH: loop header
LB: loop body
LE: loop exit
PB: predicated region body
PF: predicated region fallthrough
CT: control target
= control target key end

     0   :  { %v156_v3 = vmov 0   ;;  %s249_s0 = inlined_call_operand.vmem [shape: f32[64,1], index: 0, kind: input, shape index: {}]   ;;  %s250_s1 = inlined_call_operand.vmem [shape: f32[64,8], index: 1, kind: input, shape index: {}]   ;;  %s251_s2 = inlined_call_operand.vmem [shape: f32[1,8], index: 2, kind: input, shape index: {}]   ;;  %s252_s3 = inlined_call_operand.hbm [shape: f32[1,8], index: 3, kind: output, shape index: {}]  }
   0x1   :  { %v17_v0 = vld [vmem:[%s249_s0 + $0x10] sm:$0xff]  ;;  %v15_v1 = vld [vmem:[%s249_s0] sm:$0xff]  ;;  %v18_v2 = vld [vmem:[%s249_s0 + $0x18] sm:$0xff]  ;;  %131 = vset.pattern.permute.xlu1 %v156_v3  ;;  %130 = vset.pattern.permute.xlu0 %v156_v3 }
   0x2   :  { %v25_v4 = vadd.f32 %v17_v0, %v17_v0  ;;  %v23_v5 = vadd.f32 %v15_v1, %v15_v1  ;;  %v16_v6 = vld [vmem:[%s249_s0 + $0x8] sm:$0xff]  ;;  %v26_v7 = vadd.f32 %v18_v2, %v18_v2 }
   0x3   :  { %v24_v8 = vadd.f32 %v16_v6, %v16_v6 }
   0x4   :  { %51 = vperm.xlu1 %131, %v25_v4   ;;  %41 = vperm.xlu0 %130, %v23_v5  }
   0x5   :  { %8 = vsyncpa [#allocation3], 0  ;;  %v20_v9 = vld [vmem:[%s249_s0 + $0x28] sm:$0xff]  ;;  %v19_v10 = vld [vmem:[%s249_s0 + $0x20] sm:$0xff]  ;;  %vm87_vm0 = vcmask 64512   ;;  %s157_s17 = smov [#allocation2]  }
   0x6   :  { %v28_v11 = vadd.f32 %v20_v9, %v20_v9  ;;  %v27_v12 = vadd.f32 %v19_v10, %v19_v10  ;;  %v22_v13 = vld [vmem:[%s249_s0 + $0x38] sm:$0xff]  ;;  %v21_v14 = vld [vmem:[%s249_s0 + $0x30] sm:$0xff]  ;;  %v31_v18 = vld [vmem:[%s250_s1] sm:$0xff]  ;;  %s120_s18 = sshll.u32 %s157_s17, 4  ;;  %vm112_vm1 = vcmask 57344   ;;  %s121_s18 = int_to_ptr.vmem [resolvable:$true] %s120_s18 }
   0x7   :  { %v30_v15 = vadd.f32 %v22_v13, %v22_v13  ;;  %v29_v16 = vadd.f32 %v21_v14, %v21_v14  ;;  %v33_v20 = vld [vmem:[%s250_s1 + $0x10] sm:$0xff]  ;;  %v32_v21 = vld [vmem:[%s250_s1 + $0x8] sm:$0xff]  ;;  %v34_v23 = vld [vmem:[%s250_s1 + $0x18] sm:$0xff]  ;;  %s132_s19 = scalar_lea.vmem %s121_s18, 16  ;;  %s136_s20 = scalar_lea.vmem %s121_s18, 32 }
   0x8   :  { %56 = vperm.xlu1 %131, %v26_v7   ;;  %46 = vperm.xlu0 %130, %v24_v8   ;;  %v35_v28 = vld [vmem:[%s250_s1 + $0x20] sm:$0xff]  ;;  %v36_v33 = vld [vmem:[%s250_s1 + $0x28] sm:$0xff]  ;;  %v37_v39 = vld [vmem:[%s250_s1 + $0x30] sm:$0xff]  ;;  %p133_p0 = scmp.ne.s32.totalorder %s121_s18, %s132_s19  ;;  %p137_p1 = scmp.lt.s32.totalorder %s121_s18, %s121_s18 }
   0x9   :  { %v38_v43 = vld [vmem:[%s250_s1 + $0x38] sm:$0xff]  ;;  %v109_v61 = vld [vmem:[%s251_s2] sm:$0x1]  ;;  %p138_p2 = scmp.lt.s32.totalorder %s136_s20, %s132_s19 }
   0xb   :  { %p139_p3 = por %p138_p2, %p137_p1 }
   0xc   :  { %66 = vperm.xlu1 %131, %v28_v11   ;;  %61 = vperm.xlu0 %130, %v27_v12  }
   0xd   :  { %p140_p4 = pnand %p139_p3, %p133_p0 }
  0x10   :  { %76 = vperm.xlu1 %131, %v30_v15   ;;  %71 = vperm.xlu0 %130, %v29_v16  }
  0x83   :  { %v52_v17 = vpop.permute.xlu1 %51  ;;  %v42_v19 = vpop.permute.xlu0 %41 }
  0x84   :  { %v79_v22 = vmul.f32 %v42_v19, %v31_v18  ;;  %v81_v26 = vmul.f32 %v52_v17, %v33_v20 }
  0x86   :  { %v88_v29 = vsel %vm87_vm0, %v79_v22, 0.0  ;;  %v91_v36 = vsel %vm87_vm0, %v81_v26, 0.0 }
  0x87   :  { %v57_v24 = vpop.permute.xlu1 %56  ;;  %v47_v25 = vpop.permute.xlu0 %46 }
  0x88   :  { %v80_v27 = vmul.f32 %v47_v25, %v32_v21  ;;  %v82_v30 = vmul.f32 %v57_v24, %v34_v23 }
  0x8a   :  { %v89_v31 = vsel %vm87_vm0, %v80_v27, 0.0  ;;  %v93_v40 = vsel %vm87_vm0, %v82_v30, 0.0 }
  0x8b   :  { %v90_v32 = vadd.f32 %v89_v31, %v88_v29  ;;  %v67_v34 = vpop.permute.xlu1 %66  ;;  %v62_v35 = vpop.permute.xlu0 %61 }
  0x8c   :  { %v83_v37 = vmul.f32 %v62_v35, %v35_v28  ;;  %v84_v41 = vmul.f32 %v67_v34, %v36_v33 }
  0x8d   :  { %v92_v38 = vadd.f32 %v91_v36, %v90_v32 }
  0x8e   :  { %v95_v46 = vsel %vm87_vm0, %v83_v37, 0.0  ;;  %v97_v49 = vsel %vm87_vm0, %v84_v41, 0.0 }
  0x8f   :  { %v94_v42 = vadd.f32 %v93_v40, %v92_v38  ;;  %v77_v44 = vpop.permute.xlu1 %76  ;;  %v72_v45 = vpop.permute.xlu0 %71 }
  0x90   :  { %v85_v47 = vmul.f32 %v72_v45, %v37_v39  ;;  %v86_v50 = vmul.f32 %v77_v44, %v38_v43 }
  0x91   :  { %v96_v48 = vadd.f32 %v95_v46, %v94_v42 }
  0x92   :  { %v99_v52 = vsel %vm87_vm0, %v85_v47, 0.0  ;;  %v101_v54 = vsel %vm87_vm0, %v86_v50, 0.0 }
  0x93   :  { %v98_v51 = vadd.f32 %v97_v49, %v96_v48 }
  0x95   :  { %v100_v53 = vadd.f32 %v99_v52, %v98_v51 }
  0x97   :  { %v102_v55 = vadd.f32 %v101_v54, %v100_v53 }
  0x99   :  { %v103_v56 = vrot.slane %v102_v55, 4 }
  0x9b   :  { %v104_v57 = vadd.f32 %v103_v56, %v102_v55 }
  0x9d   :  { %v105_v58 = vrot.slane %v104_v57, 2 }
  0x9f   :  { %v106_v59 = vadd.f32 %v105_v58, %v104_v57 }
  0xa1   :  { %v107_v60 = vrot.slane %v106_v59, 1 }
  0xa3   :  { %v108_v62 = vadd.f32 %v107_v60, %v106_v59 }
  0xa5   :  { %v110_v63 = vadd.f32 %v109_v61, %v108_v62 }
  0xa7   :  { %v111_v0 = vmax.f32 %v110_v63, 0.0 }
  0xa9   :  { %113 = vst.msk [vmem:[#allocation2] sm:$0x1] %vm112_vm1, %v111_v0 }
  0xaa   :  { %143 = shalt.err (!%p140_p4)
}
  0xab   :  { %s144_s2 = scalar_lea.hbm %s252_s3, 16 }
  0xac   :  { %p145_p5 = scmp.ne.s32.totalorder %s252_s3, %s144_s2  ;;  %p148_p6 = scmp.lt.u32.totalorder %s144_s2, %s252_s3 }
  0xae   :  { %p150_p7 = pnand %p148_p6, %p145_p5 }
  0xb0   :  { %153 = shalt.err (!%p150_p7)
}
  0xb1   :  { %123 = dma.vmem_to_hbm [thread:$0]  %s121_s18, 16, %s252_s3, [#allocation3]  }
  0xb2   :  { %154 = dma.done.wait [#allocation3], 16  }
  0xb3   :  { %155 = vsyncadd [#allocation3], 4294967280 }
  0xb4   :  { %127 = vsyncpa [#allocation3], 1 }

</bundles_post_ra>
